<compile_context>
chip_gen: v5e
topology: v5e:2x2
jax: 0.10.0
libtpu: 0.0.40
codegen_flags: <defaults>
</compile_context>

<pallas_src>
import jax
import jax.numpy as jnp
from jax.experimental import pallas as pl
from jax.experimental.pallas import tpu as pltpu


def _round_up(x, m):
    return (x + m - 1) // m * m


def _unrolled_loop(n, body, *, unroll=8):
    """Run body(r) for r in range(n) with static (partial) unrolling.

    `n` and `unroll` are Python ints; `body` may have ref side effects.
    Small n -> fully static; large n -> pl.loop stepping by `unroll` with the
    inner `unroll` bodies statically unrolled (lets the LLO scheduler co-issue
    scalar loads / address math / DMA-descriptor pushes).
    """
    if n <= 0:
        return
    if n <= max(unroll, 32):
        for r in range(n):
            body(r)
        return
    main = (n // unroll) * unroll

    @pl.loop(0, main, step=unroll)
    def _(r0):
        for j in range(unroll):
            body(r0 + j)

    for r in range(main, n):  # static tail (empty when unroll | n)
        body(r)


# ---------------------------------------------------------------------------
# Fast path: tables resident in VMEM, in-VMEM row gather (no HBM descriptors).
# ---------------------------------------------------------------------------
def _make_vmem_gather_kernel(TB):
    def kernel(uid_ref, iid_ref,          # scalar prefetch (SMEM): int32 (B_pad,)
               user_tbl, item_tbl,        # resident VMEM tables
               wu_ref, wi_ref,            # resident VMEM: (1, D) each
               b_ref,                     # SMEM: (1,)
               out_ref,                   # VMEM out block: (1, TB)
               u_buf, i_buf):             # VMEM scratch: (TB, D)
        base = pl.program_id(0) * TB

        def gather_row(r):
            u_buf[r] = user_tbl[uid_ref[base + r]]
            i_buf[r] = item_tbl[iid_ref[base + r]]

        _unrolled_loop(TB, gather_row, unroll=8)

        # Linear(2D -> 1) as a single fused VPU multiply-add + one row reduce.
        dots = jnp.sum(u_buf[...].astype(jnp.float32) * wu_ref[...]
                       + i_buf[...].astype(jnp.float32) * wi_ref[...], axis=1)
        out_ref[0, :] = dots + b_ref[0]            # lane-dense store
    return kernel


# ---------------------------------------------------------------------------
# Large-table path: tables in HBM, manual row-DMA gather with aggregate waits
# and in-tile chunk double-buffering.
# ---------------------------------------------------------------------------
def _make_hbm_gather_kernel(TB, CH):
    NC = TB // CH                                  # static number of chunks

    def kernel(uid_ref, iid_ref,                   # scalar prefetch (SMEM)
               user_tbl, item_tbl,                 # HBM refs (pl.ANY)
               wu_ref, wi_ref,                     # resident VMEM: (1, D)
               b_ref,                              # SMEM: (1,)
               out_ref,                            # VMEM out block: (1, TB)
               u_buf, i_buf,                       # VMEM scratch: (2, CH, D)
               u_sem, i_sem):                      # DMA semaphores: (2,)
        t = pl.program_id(0)

        def issue(c, slot):
            # ids are read from SMEM *before* any .wait() (avoids the
            # sst->sld forwarding stall), and all CH row copies of this chunk
            # signal the same per-slot semaphore.
            base = t * TB + c * CH

            def issue_row(r):
                uid = uid_ref[base + r]
                iid = iid_ref[base + r]
                pltpu.make_async_copy(user_tbl.at[uid], u_buf.at[slot, r],
                                      u_sem.at[slot]).start()
                pltpu.make_async_copy(item_tbl.at[iid], i_buf.at[slot, r],
                                      i_sem.at[slot]).start()

            _unrolled_loop(CH, issue_row, unroll=8)

        def wait(slot):
            # Aggregate wait: DMA sems count bytes, so one wait whose dst is
            # the whole (CH, D) chunk waits for exactly the CH row copies.
            pltpu.make_async_copy(u_buf.at[slot], u_buf.at[slot],
                                  u_sem.at[slot]).wait()
            pltpu.make_async_copy(i_buf.at[slot], i_buf.at[slot],
                                  i_sem.at[slot]).wait()

        issue(0, 0)
        for c in range(NC):                        # static chunk loop (NC small)
            slot = c & 1
            if c + 1 < NC:                         # prefetch next chunk first
                issue(c + 1, (c + 1) & 1)
            wait(slot)
            dots = jnp.sum(u_buf[slot].astype(jnp.float32) * wu_ref[...]
                           + i_buf[slot].astype(jnp.float32) * wi_ref[...],
                           axis=1)
            out_ref[0, pl.ds(c * CH, CH)] = dots + b_ref[0]
    return kernel


def recommender_forward(user_ids, item_ids, params, *, max_tile=1024,
                        table_vmem_budget=8 * 1024 * 1024,
                        force_hbm_gather=False):
    """Forward pass equivalent to RecommenderModel.forward.

    user_ids, item_ids: int (B,);  returns float32 (B, 1).
    """
    user_table = params["user_embedding"]   # (num_users, D)
    item_table = params["item_embedding"]   # (num_items, D)
    w_user = params["fc_w_user"].astype(jnp.float32)   # (1, D)
    w_item = params["fc_w_item"].astype(jnp.float32)   # (1, D)
    b = params["fc_b"].astype(jnp.float32)              # (1,)

    num_users, D = user_table.shape
    num_items = item_table.shape[0]
    B = int(user_ids.shape[0])
    user_ids = user_ids.astype(jnp.int32)
    item_ids = item_ids.astype(jnp.int32)

    itemsize = user_table.dtype.itemsize
    tables_bytes = (num_users + num_items) * D * itemsize
    use_vmem_tables = (not force_hbm_gather) and tables_bytes <= table_vmem_budget

    # ---- batch-tile size --------------------------------------------------
    if B <= 128:
        TB = B                                      # single tile ("full array" block)
    else:
        # >=2 tiles so the "parallel" grid axis can split across v7x's 2 TCs,
        # capped by max_tile (amortizes ~0.35us per grid step).
        TB = min(max_tile, _round_up(pl.cdiv(B, 2), 128))
        if use_vmem_tables:
            # keep the two (TB, D) gather scratch buffers under ~8 MiB
            cap = max(128, (8 * 1024 * 1024) // (2 * D * itemsize) // 128 * 128)
            TB = min(TB, cap)
    num_tiles = pl.cdiv(B, TB)
    B_pad = num_tiles * TB
    if B_pad != B:
        pad = B_pad - B
        user_ids = jnp.pad(user_ids, (0, pad))      # pad rows gather row 0, discarded
        item_ids = jnp.pad(item_ids, (0, pad))

    # TODO(synk): for very large B (>~128K) pass the ids as per-tile SMEM blocks
    # instead of scalar-prefetching the whole arrays (1-D SMEM padding limit).

    common_in_specs = [
        pl.BlockSpec(memory_space=pltpu.MemorySpace.VMEM),   # w_user (1, D)
        pl.BlockSpec(memory_space=pltpu.MemorySpace.VMEM),   # w_item (1, D)
        pl.BlockSpec(memory_space=pltpu.MemorySpace.SMEM),   # bias (1,)
    ]
    out_spec = pl.BlockSpec((1, TB), lambda t, uid, iid: (0, t))

    if use_vmem_tables:
        kernel = _make_vmem_gather_kernel(TB)
        in_specs = [pl.BlockSpec(memory_space=pltpu.MemorySpace.VMEM),   # user table
                    pl.BlockSpec(memory_space=pltpu.MemorySpace.VMEM),   # item table
                    ] + common_in_specs
        scratch_shapes = [pltpu.VMEM((TB, D), user_table.dtype),
                          pltpu.VMEM((TB, D), item_table.dtype)]
    else:
        CH = min(TB, 128)            # TB is either <=128 or a multiple of 128
        kernel = _make_hbm_gather_kernel(TB, CH)
        in_specs = [pl.BlockSpec(memory_space=pl.ANY),                   # user table (HBM)
                    pl.BlockSpec(memory_space=pl.ANY),                   # item table (HBM)
                    ] + common_in_specs
        scratch_shapes = [pltpu.VMEM((2, CH, D), user_table.dtype),
                          pltpu.VMEM((2, CH, D), item_table.dtype),
                          pltpu.SemaphoreType.DMA((2,)),
                          pltpu.SemaphoreType.DMA((2,))]

    grid_spec = pltpu.PrefetchScalarGridSpec(
        num_scalar_prefetch=2,
        grid=(num_tiles,),
        in_specs=in_specs,
        out_specs=out_spec,
        scratch_shapes=scratch_shapes,
    )

    out = pl.pallas_call(
        kernel,
        out_shape=jax.ShapeDtypeStruct((1, B_pad), jnp.float32),
        grid_spec=grid_spec,
        compiler_params=pltpu.CompilerParams(
            # Independent batch tiles -> shard across TensorCores on v7x.
            dimension_semantics=("parallel",),
            # Explicit, safe on v5e (128 MiB phys), v6e (128), v7x (64).
            vmem_limit_bytes=32 * 1024 * 1024,
        ),
    )(user_ids, item_ids, user_table, item_table, w_user, w_item, b)

    return out[0, :B].reshape(B, 1)


def init_params(num_users, num_items, embedding_dim, key):
    """Deterministic parameter init mirroring the PyTorch module's shapes."""
    k_u, k_i, k_w, k_b = jax.random.split(key, 4)
    # nn.Embedding default: N(0, 1)
    user_embedding = jax.random.normal(k_u, (num_users, embedding_dim), jnp.float32)
    item_embedding = jax.random.normal(k_i, (num_items, embedding_dim), jnp.float32)
    # nn.Linear default: U(-1/sqrt(fan_in), 1/sqrt(fan_in)), fan_in = 2*D
    fan_in = 2 * embedding_dim
    bound = 1.0 / jnp.sqrt(jnp.float32(fan_in))
    fc_w = jax.random.uniform(k_w, (1, fan_in), jnp.float32, -bound, bound)  # PyTorch (out, in)
    fc_b = jax.random.uniform(k_b, (1,), jnp.float32, -bound, bound)
    return {
        "user_embedding": user_embedding,
        "item_embedding": item_embedding,
        "fc_w_user": fc_w[:, :embedding_dim],   # (1, D): user half of the concat
        "fc_w_item": fc_w[:, embedding_dim:],   # (1, D): item half of the concat
        "fc_b": fc_b,                           # (1,)
    }


if __name__ == "__main__":
    num_users = 16
    num_items = 32
    embedding_dim = 32
    batch = 8

    key = jax.random.PRNGKey(0)
    k_params, k_uid, k_iid = jax.random.split(key, 3)

    params = init_params(num_users, num_items, embedding_dim, k_params)
    user_ids = jax.random.randint(k_uid, (batch,), 0, num_users, dtype=jnp.int32)
    item_ids = jax.random.randint(k_iid, (batch,), 0, num_items, dtype=jnp.int32)

    # Plain-JAX reference of the same forward pass.
    u = jnp.take(params["user_embedding"], user_ids, axis=0)
    i = jnp.take(params["item_embedding"], item_ids, axis=0)
    w_full = jnp.concatenate([params["fc_w_user"], params["fc_w_item"]], axis=1)  # (1, 2D)
    ref = jnp.concatenate([u, i], axis=1) @ w_full.T + params["fc_b"][0]

    # Fast path (tables resident in VMEM, in-VMEM gather).
    out_vmem = jax.block_until_ready(recommender_forward(user_ids, item_ids, params))
    # Large-table path (HBM row-DMA gather with aggregate waits + chunk
    # double-buffering), forced here for coverage at the small demo sizes.
    out_hbm = jax.block_until_ready(
        recommender_forward(user_ids, item_ids, params, force_hbm_gather=True))

    assert out_vmem.shape == (batch, 1) and out_hbm.shape == (batch, 1)
    assert jnp.allclose(out_vmem, ref, atol=1e-5, rtol=1e-5)
    assert jnp.allclose(out_hbm, ref, atol=1e-5, rtol=1e-5)

    print("KERNEL_OK")
</pallas_src>

<mosaic_0001>
module attributes {stable_mosaic.version = 11 : i64} {
  func.func @kernel(%arg0: i32, %arg1: memref<8xi32, #tpu.memory_space<smem>>, %arg2: memref<8xi32, #tpu.memory_space<smem>>, %arg3: memref<16x32xf32, #tpu.memory_space<vmem>>, %arg4: memref<32x32xf32, #tpu.memory_space<vmem>>, %arg5: memref<1x32xf32, #tpu.memory_space<vmem>>, %arg6: memref<1x32xf32, #tpu.memory_space<vmem>>, %arg7: memref<1xf32, #tpu.memory_space<smem>>, %arg8: memref<1x8xf32, #tpu.memory_space<vmem>>, %arg9: memref<8x32xf32, #tpu.memory_space<vmem>>, %arg10: memref<8x32xf32, #tpu.memory_space<vmem>>) attributes {dimension_semantics = [#tpu.dimension_semantics<parallel>], iteration_bounds = array<i64: 1>, scalar_prefetch = 2 : i64, scratch_operands = 2 : i64, tpu.core_type = #tpu.core_type<tc>, window_params = [{pipeline_mode = #tpu.pipeline_mode<synchronous>, transform_indices = @transform_0, window_bounds = array<i64: 16, 32>}, {pipeline_mode = #tpu.pipeline_mode<synchronous>, transform_indices = @transform_1, window_bounds = array<i64: 32, 32>}, {pipeline_mode = #tpu.pipeline_mode<synchronous>, transform_indices = @transform_2, window_bounds = array<i64: 1, 32>}, {pipeline_mode = #tpu.pipeline_mode<synchronous>, transform_indices = @transform_3, window_bounds = array<i64: 1, 32>}, {transform_indices = @transform_4, window_bounds = array<i64: 1>}, {transform_indices = @transform_5, window_bounds = array<i64: 1, 8>}]} {
    %c8_i32 = arith.constant 8 : i32
    %0 = arith.muli %arg0, %c8_i32 : i32
    %c0_i32 = arith.constant 0 : i32
    %1 = arith.addi %0, %c0_i32 : i32
    %2 = arith.index_cast %1 : i32 to index
    %3 = memref.load %arg1[%2] : memref<8xi32, #tpu.memory_space<smem>>
    %4 = arith.index_cast %3 : i32 to index
    %c0 = arith.constant 0 : index
    %5 = vector.load %arg3[%4, %c0] : memref<16x32xf32, #tpu.memory_space<vmem>>, vector<1x32xf32>
    %6 = vector.shape_cast %5 : vector<1x32xf32> to vector<32xf32>
    %c0_0 = arith.constant 0 : index
    %c0_1 = arith.constant 0 : index
    %7 = vector.load %arg9[%c0_0, %c0_1] : memref<8x32xf32, #tpu.memory_space<vmem>>, vector<1x32xf32>
    %8 = vector.shape_cast %7 : vector<1x32xf32> to vector<32xf32>
    %9 = vector.shape_cast %6 : vector<32xf32> to vector<1x32xf32>
    tpu.vector_store %arg9[%c0_0, %c0_1], %9 {strides = array<i32>} : memref<8x32xf32, #tpu.memory_space<vmem>>, vector<1x32xf32>,
    %c0_i32_2 = arith.constant 0 : i32
    %10 = arith.addi %0, %c0_i32_2 : i32
    %11 = arith.index_cast %10 : i32 to index
    %12 = memref.load %arg2[%11] : memref<8xi32, #tpu.memory_space<smem>>
    %13 = arith.index_cast %12 : i32 to index
    %c0_3 = arith.constant 0 : index
    %14 = vector.load %arg4[%13, %c0_3] : memref<32x32xf32, #tpu.memory_space<vmem>>, vector<1x32xf32>
    %15 = vector.shape_cast %14 : vector<1x32xf32> to vector<32xf32>
    %c0_4 = arith.constant 0 : index
    %c0_5 = arith.constant 0 : index
    %16 = vector.load %arg10[%c0_4, %c0_5] : memref<8x32xf32, #tpu.memory_space<vmem>>, vector<1x32xf32>
    %17 = vector.shape_cast %16 : vector<1x32xf32> to vector<32xf32>
    %18 = vector.shape_cast %15 : vector<32xf32> to vector<1x32xf32>
    tpu.vector_store %arg10[%c0_4, %c0_5], %18 {strides = array<i32>} : memref<8x32xf32, #tpu.memory_space<vmem>>, vector<1x32xf32>,
    %c1_i32 = arith.constant 1 : i32
    %19 = arith.addi %0, %c1_i32 : i32
    %20 = arith.index_cast %19 : i32 to index
    %21 = memref.load %arg1[%20] : memref<8xi32, #tpu.memory_space<smem>>
    %22 = arith.index_cast %21 : i32 to index
    %c0_6 = arith.constant 0 : index
    %23 = vector.load %arg3[%22, %c0_6] : memref<16x32xf32, #tpu.memory_space<vmem>>, vector<1x32xf32>
    %24 = vector.shape_cast %23 : vector<1x32xf32> to vector<32xf32>
    %c1 = arith.constant 1 : index
    %c0_7 = arith.constant 0 : index
    %25 = vector.load %arg9[%c1, %c0_7] : memref<8x32xf32, #tpu.memory_space<vmem>>, vector<1x32xf32>
    %26 = vector.shape_cast %25 : vector<1x32xf32> to vector<32xf32>
    %27 = vector.shape_cast %24 : vector<32xf32> to vector<1x32xf32>
    tpu.vector_store %arg9[%c1, %c0_7], %27 {strides = array<i32>} : memref<8x32xf32, #tpu.memory_space<vmem>>, vector<1x32xf32>,
    %c1_i32_8 = arith.constant 1 : i32
    %28 = arith.addi %0, %c1_i32_8 : i32
    %29 = arith.index_cast %28 : i32 to index
    %30 = memref.load %arg2[%29] : memref<8xi32, #tpu.memory_space<smem>>
    %31 = arith.index_cast %30 : i32 to index
    %c0_9 = arith.constant 0 : index
    %32 = vector.load %arg4[%31, %c0_9] : memref<32x32xf32, #tpu.memory_space<vmem>>, vector<1x32xf32>
    %33 = vector.shape_cast %32 : vector<1x32xf32> to vector<32xf32>
    %c1_10 = arith.constant 1 : index
    %c0_11 = arith.constant 0 : index
    %34 = vector.load %arg10[%c1_10, %c0_11] : memref<8x32xf32, #tpu.memory_space<vmem>>, vector<1x32xf32>
    %35 = vector.shape_cast %34 : vector<1x32xf32> to vector<32xf32>
    %36 = vector.shape_cast %33 : vector<32xf32> to vector<1x32xf32>
    tpu.vector_store %arg10[%c1_10, %c0_11], %36 {strides = array<i32>} : memref<8x32xf32, #tpu.memory_space<vmem>>, vector<1x32xf32>,
    %c2_i32 = arith.constant 2 : i32
    %37 = arith.addi %0, %c2_i32 : i32
    %38 = arith.index_cast %37 : i32 to index
    %39 = memref.load %arg1[%38] : memref<8xi32, #tpu.memory_space<smem>>
    %40 = arith.index_cast %39 : i32 to index
    %c0_12 = arith.constant 0 : index
    %41 = vector.load %arg3[%40, %c0_12] : memref<16x32xf32, #tpu.memory_space<vmem>>, vector<1x32xf32>
    %42 = vector.shape_cast %41 : vector<1x32xf32> to vector<32xf32>
    %c2 = arith.constant 2 : index
    %c0_13 = arith.constant 0 : index
    %43 = vector.load %arg9[%c2, %c0_13] : memref<8x32xf32, #tpu.memory_space<vmem>>, vector<1x32xf32>
    %44 = vector.shape_cast %43 : vector<1x32xf32> to vector<32xf32>
    %45 = vector.shape_cast %42 : vector<32xf32> to vector<1x32xf32>
    tpu.vector_store %arg9[%c2, %c0_13], %45 {strides = array<i32>} : memref<8x32xf32, #tpu.memory_space<vmem>>, vector<1x32xf32>,
    %c2_i32_14 = arith.constant 2 : i32
    %46 = arith.addi %0, %c2_i32_14 : i32
    %47 = arith.index_cast %46 : i32 to index
    %48 = memref.load %arg2[%47] : memref<8xi32, #tpu.memory_space<smem>>
    %49 = arith.index_cast %48 : i32 to index
    %c0_15 = arith.constant 0 : index
    %50 = vector.load %arg4[%49, %c0_15] : memref<32x32xf32, #tpu.memory_space<vmem>>, vector<1x32xf32>
    %51 = vector.shape_cast %50 : vector<1x32xf32> to vector<32xf32>
    %c2_16 = arith.constant 2 : index
    %c0_17 = arith.constant 0 : index
    %52 = vector.load %arg10[%c2_16, %c0_17] : memref<8x32xf32, #tpu.memory_space<vmem>>, vector<1x32xf32>
    %53 = vector.shape_cast %52 : vector<1x32xf32> to vector<32xf32>
    %54 = vector.shape_cast %51 : vector<32xf32> to vector<1x32xf32>
    tpu.vector_store %arg10[%c2_16, %c0_17], %54 {strides = array<i32>} : memref<8x32xf32, #tpu.memory_space<vmem>>, vector<1x32xf32>,
    %c3_i32 = arith.constant 3 : i32
    %55 = arith.addi %0, %c3_i32 : i32
    %56 = arith.index_cast %55 : i32 to index
    %57 = memref.load %arg1[%56] : memref<8xi32, #tpu.memory_space<smem>>
    %58 = arith.index_cast %57 : i32 to index
    %c0_18 = arith.constant 0 : index
    %59 = vector.load %arg3[%58, %c0_18] : memref<16x32xf32, #tpu.memory_space<vmem>>, vector<1x32xf32>
    %60 = vector.shape_cast %59 : vector<1x32xf32> to vector<32xf32>
    %c3 = arith.constant 3 : index
    %c0_19 = arith.constant 0 : index
    %61 = vector.load %arg9[%c3, %c0_19] : memref<8x32xf32, #tpu.memory_space<vmem>>, vector<1x32xf32>
    %62 = vector.shape_cast %61 : vector<1x32xf32> to vector<32xf32>
    %63 = vector.shape_cast %60 : vector<32xf32> to vector<1x32xf32>
    tpu.vector_store %arg9[%c3, %c0_19], %63 {strides = array<i32>} : memref<8x32xf32, #tpu.memory_space<vmem>>, vector<1x32xf32>,
    %c3_i32_20 = arith.constant 3 : i32
    %64 = arith.addi %0, %c3_i32_20 : i32
    %65 = arith.index_cast %64 : i32 to index
    %66 = memref.load %arg2[%65] : memref<8xi32, #tpu.memory_space<smem>>
    %67 = arith.index_cast %66 : i32 to index
    %c0_21 = arith.constant 0 : index
    %68 = vector.load %arg4[%67, %c0_21] : memref<32x32xf32, #tpu.memory_space<vmem>>, vector<1x32xf32>
    %69 = vector.shape_cast %68 : vector<1x32xf32> to vector<32xf32>
    %c3_22 = arith.constant 3 : index
    %c0_23 = arith.constant 0 : index
    %70 = vector.load %arg10[%c3_22, %c0_23] : memref<8x32xf32, #tpu.memory_space<vmem>>, vector<1x32xf32>
    %71 = vector.shape_cast %70 : vector<1x32xf32> to vector<32xf32>
    %72 = vector.shape_cast %69 : vector<32xf32> to vector<1x32xf32>
    tpu.vector_store %arg10[%c3_22, %c0_23], %72 {strides = array<i32>} : memref<8x32xf32, #tpu.memory_space<vmem>>, vector<1x32xf32>,
    %c4_i32 = arith.constant 4 : i32
    %73 = arith.addi %0, %c4_i32 : i32
    %74 = arith.index_cast %73 : i32 to index
    %75 = memref.load %arg1[%74] : memref<8xi32, #tpu.memory_space<smem>>
    %76 = arith.index_cast %75 : i32 to index
    %c0_24 = arith.constant 0 : index
    %77 = vector.load %arg3[%76, %c0_24] : memref<16x32xf32, #tpu.memory_space<vmem>>, vector<1x32xf32>
    %78 = vector.shape_cast %77 : vector<1x32xf32> to vector<32xf32>
    %c4 = arith.constant 4 : index
    %c0_25 = arith.constant 0 : index
    %79 = vector.load %arg9[%c4, %c0_25] : memref<8x32xf32, #tpu.memory_space<vmem>>, vector<1x32xf32>
    %80 = vector.shape_cast %79 : vector<1x32xf32> to vector<32xf32>
    %81 = vector.shape_cast %78 : vector<32xf32> to vector<1x32xf32>
    tpu.vector_store %arg9[%c4, %c0_25], %81 {strides = array<i32>} : memref<8x32xf32, #tpu.memory_space<vmem>>, vector<1x32xf32>,
    %c4_i32_26 = arith.constant 4 : i32
    %82 = arith.addi %0, %c4_i32_26 : i32
    %83 = arith.index_cast %82 : i32 to index
    %84 = memref.load %arg2[%83] : memref<8xi32, #tpu.memory_space<smem>>
    %85 = arith.index_cast %84 : i32 to index
    %c0_27 = arith.constant 0 : index
    %86 = vector.load %arg4[%85, %c0_27] : memref<32x32xf32, #tpu.memory_space<vmem>>, vector<1x32xf32>
    %87 = vector.shape_cast %86 : vector<1x32xf32> to vector<32xf32>
    %c4_28 = arith.constant 4 : index
    %c0_29 = arith.constant 0 : index
    %88 = vector.load %arg10[%c4_28, %c0_29] : memref<8x32xf32, #tpu.memory_space<vmem>>, vector<1x32xf32>
    %89 = vector.shape_cast %88 : vector<1x32xf32> to vector<32xf32>
    %90 = vector.shape_cast %87 : vector<32xf32> to vector<1x32xf32>
    tpu.vector_store %arg10[%c4_28, %c0_29], %90 {strides = array<i32>} : memref<8x32xf32, #tpu.memory_space<vmem>>, vector<1x32xf32>,
    %c5_i32 = arith.constant 5 : i32
    %91 = arith.addi %0, %c5_i32 : i32
    %92 = arith.index_cast %91 : i32 to index
    %93 = memref.load %arg1[%92] : memref<8xi32, #tpu.memory_space<smem>>
    %94 = arith.index_cast %93 : i32 to index
    %c0_30 = arith.constant 0 : index
    %95 = vector.load %arg3[%94, %c0_30] : memref<16x32xf32, #tpu.memory_space<vmem>>, vector<1x32xf32>
    %96 = vector.shape_cast %95 : vector<1x32xf32> to vector<32xf32>
    %c5 = arith.constant 5 : index
    %c0_31 = arith.constant 0 : index
    %97 = vector.load %arg9[%c5, %c0_31] : memref<8x32xf32, #tpu.memory_space<vmem>>, vector<1x32xf32>
    %98 = vector.shape_cast %97 : vector<1x32xf32> to vector<32xf32>
    %99 = vector.shape_cast %96 : vector<32xf32> to vector<1x32xf32>
    tpu.vector_store %arg9[%c5, %c0_31], %99 {strides = array<i32>} : memref<8x32xf32, #tpu.memory_space<vmem>>, vector<1x32xf32>,
    %c5_i32_32 = arith.constant 5 : i32
    %100 = arith.addi %0, %c5_i32_32 : i32
    %101 = arith.index_cast %100 : i32 to index
    %102 = memref.load %arg2[%101] : memref<8xi32, #tpu.memory_space<smem>>
    %103 = arith.index_cast %102 : i32 to index
    %c0_33 = arith.constant 0 : index
    %104 = vector.load %arg4[%103, %c0_33] : memref<32x32xf32, #tpu.memory_space<vmem>>, vector<1x32xf32>
    %105 = vector.shape_cast %104 : vector<1x32xf32> to vector<32xf32>
    %c5_34 = arith.constant 5 : index
    %c0_35 = arith.constant 0 : index
    %106 = vector.load %arg10[%c5_34, %c0_35] : memref<8x32xf32, #tpu.memory_space<vmem>>, vector<1x32xf32>
    %107 = vector.shape_cast %106 : vector<1x32xf32> to vector<32xf32>
    %108 = vector.shape_cast %105 : vector<32xf32> to vector<1x32xf32>
    tpu.vector_store %arg10[%c5_34, %c0_35], %108 {strides = array<i32>} : memref<8x32xf32, #tpu.memory_space<vmem>>, vector<1x32xf32>,
    %c6_i32 = arith.constant 6 : i32
    %109 = arith.addi %0, %c6_i32 : i32
    %110 = arith.index_cast %109 : i32 to index
    %111 = memref.load %arg1[%110] : memref<8xi32, #tpu.memory_space<smem>>
    %112 = arith.index_cast %111 : i32 to index
    %c0_36 = arith.constant 0 : index
    %113 = vector.load %arg3[%112, %c0_36] : memref<16x32xf32, #tpu.memory_space<vmem>>, vector<1x32xf32>
    %114 = vector.shape_cast %113 : vector<1x32xf32> to vector<32xf32>
    %c6 = arith.constant 6 : index
    %c0_37 = arith.constant 0 : index
    %115 = vector.load %arg9[%c6, %c0_37] : memref<8x32xf32, #tpu.memory_space<vmem>>, vector<1x32xf32>
    %116 = vector.shape_cast %115 : vector<1x32xf32> to vector<32xf32>
    %117 = vector.shape_cast %114 : vector<32xf32> to vector<1x32xf32>
    tpu.vector_store %arg9[%c6, %c0_37], %117 {strides = array<i32>} : memref<8x32xf32, #tpu.memory_space<vmem>>, vector<1x32xf32>,
    %c6_i32_38 = arith.constant 6 : i32
    %118 = arith.addi %0, %c6_i32_38 : i32
    %119 = arith.index_cast %118 : i32 to index
    %120 = memref.load %arg2[%119] : memref<8xi32, #tpu.memory_space<smem>>
    %121 = arith.index_cast %120 : i32 to index
    %c0_39 = arith.constant 0 : index
    %122 = vector.load %arg4[%121, %c0_39] : memref<32x32xf32, #tpu.memory_space<vmem>>, vector<1x32xf32>
    %123 = vector.shape_cast %122 : vector<1x32xf32> to vector<32xf32>
    %c6_40 = arith.constant 6 : index
    %c0_41 = arith.constant 0 : index
    %124 = vector.load %arg10[%c6_40, %c0_41] : memref<8x32xf32, #tpu.memory_space<vmem>>, vector<1x32xf32>
    %125 = vector.shape_cast %124 : vector<1x32xf32> to vector<32xf32>
    %126 = vector.shape_cast %123 : vector<32xf32> to vector<1x32xf32>
    tpu.vector_store %arg10[%c6_40, %c0_41], %126 {strides = array<i32>} : memref<8x32xf32, #tpu.memory_space<vmem>>, vector<1x32xf32>,
    %c7_i32 = arith.constant 7 : i32
    %127 = arith.addi %0, %c7_i32 : i32
    %128 = arith.index_cast %127 : i32 to index
    %129 = memref.load %arg1[%128] : memref<8xi32, #tpu.memory_space<smem>>
    %130 = arith.index_cast %129 : i32 to index
    %c0_42 = arith.constant 0 : index
    %131 = vector.load %arg3[%130, %c0_42] : memref<16x32xf32, #tpu.memory_space<vmem>>, vector<1x32xf32>
    %132 = vector.shape_cast %131 : vector<1x32xf32> to vector<32xf32>
    %c7 = arith.constant 7 : index
    %c0_43 = arith.constant 0 : index
    %133 = vector.load %arg9[%c7, %c0_43] : memref<8x32xf32, #tpu.memory_space<vmem>>, vector<1x32xf32>
    %134 = vector.shape_cast %133 : vector<1x32xf32> to vector<32xf32>
    %135 = vector.shape_cast %132 : vector<32xf32> to vector<1x32xf32>
    tpu.vector_store %arg9[%c7, %c0_43], %135 {strides = array<i32>} : memref<8x32xf32, #tpu.memory_space<vmem>>, vector<1x32xf32>,
    %c7_i32_44 = arith.constant 7 : i32
    %136 = arith.addi %0, %c7_i32_44 : i32
    %137 = arith.index_cast %136 : i32 to index
    %138 = memref.load %arg2[%137] : memref<8xi32, #tpu.memory_space<smem>>
    %139 = arith.index_cast %138 : i32 to index
    %c0_45 = arith.constant 0 : index
    %140 = vector.load %arg4[%139, %c0_45] : memref<32x32xf32, #tpu.memory_space<vmem>>, vector<1x32xf32>
    %141 = vector.shape_cast %140 : vector<1x32xf32> to vector<32xf32>
    %c7_46 = arith.constant 7 : index
    %c0_47 = arith.constant 0 : index
    %142 = vector.load %arg10[%c7_46, %c0_47] : memref<8x32xf32, #tpu.memory_space<vmem>>, vector<1x32xf32>
    %143 = vector.shape_cast %142 : vector<1x32xf32> to vector<32xf32>
    %144 = vector.shape_cast %141 : vector<32xf32> to vector<1x32xf32>
    tpu.vector_store %arg10[%c7_46, %c0_47], %144 {strides = array<i32>} : memref<8x32xf32, #tpu.memory_space<vmem>>, vector<1x32xf32>,
    %c0_48 = arith.constant 0 : index
    %c0_49 = arith.constant 0 : index
    %145 = vector.load %arg9[%c0_48, %c0_49] : memref<8x32xf32, #tpu.memory_space<vmem>>, vector<8x32xf32>
    %c0_50 = arith.constant 0 : index
    %c0_51 = arith.constant 0 : index
    %146 = vector.load %arg5[%c0_50, %c0_51] : memref<1x32xf32, #tpu.memory_space<vmem>>, vector<1x32xf32>
    %147 = vector.broadcast %146 : vector<1x32xf32> to vector<8x32xf32>
    %148 = arith.mulf %145, %147 : vector<8x32xf32>
    %c0_52 = arith.constant 0 : index
    %c0_53 = arith.constant 0 : index
    %149 = vector.load %arg10[%c0_52, %c0_53] : memref<8x32xf32, #tpu.memory_space<vmem>>, vector<8x32xf32>
    %c0_54 = arith.constant 0 : index
    %c0_55 = arith.constant 0 : index
    %150 = vector.load %arg6[%c0_54, %c0_55] : memref<1x32xf32, #tpu.memory_space<vmem>>, vector<1x32xf32>
    %151 = vector.broadcast %150 : vector<1x32xf32> to vector<8x32xf32>
    %152 = arith.mulf %149, %151 : vector<8x32xf32>
    %153 = arith.addf %148, %152 : vector<8x32xf32>
    %cst = arith.constant dense<0.000000e+00> : vector<8xf32>
    %154 = vector.multi_reduction <add>, %153, %cst [1] : vector<8x32xf32> to vector<8xf32>
    %c0_56 = arith.constant 0 : index
    %155 = memref.load %arg7[%c0_56] : memref<1xf32, #tpu.memory_space<smem>>
    %156 = vector.broadcast %155 : f32 to vector<8xf32>
    %157 = arith.addf %154, %156 : vector<8xf32>
    %c0_57 = arith.constant 0 : index
    %c0_58 = arith.constant 0 : index
    %158 = vector.load %arg8[%c0_57, %c0_58] : memref<1x8xf32, #tpu.memory_space<vmem>>, vector<1x8xf32>
    %159 = vector.shape_cast %158 : vector<1x8xf32> to vector<8xf32>
    %160 = vector.shape_cast %157 : vector<8xf32> to vector<1x8xf32>
    tpu.vector_store %arg8[%c0_57, %c0_58], %160 {strides = array<i32>} : memref<1x8xf32, #tpu.memory_space<vmem>>, vector<1x8xf32>,
    return
  }
  func.func @transform_0(%arg0: i32, %arg1: memref<8xi32, #tpu.memory_space<smem>>, %arg2: memref<8xi32, #tpu.memory_space<smem>>) -> (i32, i32) {
    %c0_i32 = arith.constant 0 : i32
    %c0_i32_0 = arith.constant 0 : i32
    %c0_i32_1 = arith.constant 0 : i32
    return %c0_i32, %c0_i32_0 : i32, i32
  }
  func.func @transform_1(%arg0: i32, %arg1: memref<8xi32, #tpu.memory_space<smem>>, %arg2: memref<8xi32, #tpu.memory_space<smem>>) -> (i32, i32) {
    %c0_i32 = arith.constant 0 : i32
    %c0_i32_0 = arith.constant 0 : i32
    %c0_i32_1 = arith.constant 0 : i32
    return %c0_i32, %c0_i32_0 : i32, i32
  }
  func.func @transform_2(%arg0: i32, %arg1: memref<8xi32, #tpu.memory_space<smem>>, %arg2: memref<8xi32, #tpu.memory_space<smem>>) -> (i32, i32) {
    %c0_i32 = arith.constant 0 : i32
    %c0_i32_0 = arith.constant 0 : i32
    %c0_i32_1 = arith.constant 0 : i32
    return %c0_i32, %c0_i32_0 : i32, i32
  }
  func.func @transform_3(%arg0: i32, %arg1: memref<8xi32, #tpu.memory_space<smem>>, %arg2: memref<8xi32, #tpu.memory_space<smem>>) -> (i32, i32) {
    %c0_i32 = arith.constant 0 : i32
    %c0_i32_0 = arith.constant 0 : i32
    %c0_i32_1 = arith.constant 0 : i32
    return %c0_i32, %c0_i32_0 : i32, i32
  }
  func.func @transform_4(%arg0: i32, %arg1: memref<8xi32, #tpu.memory_space<smem>>, %arg2: memref<8xi32, #tpu.memory_space<smem>>) -> i32 {
    %c0_i32 = arith.constant 0 : i32
    %c0_i32_0 = arith.constant 0 : i32
    return %c0_i32 : i32
  }
  func.func @transform_5(%arg0: i32, %arg1: memref<8xi32, #tpu.memory_space<smem>>, %arg2: memref<8xi32, #tpu.memory_space<smem>>) -> (i32, i32) {
    %c0_i32 = arith.constant 0 : i32
    %c0_i32_0 = arith.constant 0 : i32
    return %c0_i32, %arg0 : i32, i32
  }
}

</mosaic_0001>

<bundles_post_ra>
// kernel: tpu_custom_call.1
= control target key start
LH: loop header
LB: loop body
LE: loop exit
PB: predicated region body
PF: predicated region fallthrough
CT: control target
= control target key end

     0   :  { %s330_s30 = smov [#allocation5]   ;;  %s331_s8 = smov [#allocation6]   ;;  %s417_s0 = inlined_call_operand.vmem [shape: s32[8], index: 0, kind: input, shape index: {}]   ;;  %s418_s2 = inlined_call_operand.hbm [shape: f32[16,32], index: 2, kind: input, shape index: {}]   ;;  %s419_s3 = inlined_call_operand.hbm [shape: f32[32,32], index: 3, kind: input, shape index: {}]   ;;  %s420_s4 = inlined_call_operand.vmem [shape: f32[1,32], index: 4, kind: input, shape index: {}]   ;;  %s421_s5 = inlined_call_operand.vmem [shape: f32[1,32], index: 5, kind: input, shape index: {}]   ;;  %s422_s6 = inlined_call_operand.<no memory space> [shape: f32[1], index: 6, kind: input, shape index: {}]   ;;  %s423_s7 = inlined_call_operand.hbm [shape: f32[1,8], index: 7, kind: output, shape index: {}]   ;;  %s424_s1 = inlined_call_operand.vmem [shape: s32[8], index: 1, kind: input, shape index: {}]  }
   0x1   :  { %s13_s26 = sshll.u32 %s417_s0, 4  ;;  %s18_s29 = sshll.u32 %s424_s1, 4  ;;  %s14_s26 = int_to_ptr.vmem [resolvable:$true] %s13_s26  ;;  %s19_s29 = int_to_ptr.vmem [resolvable:$true] %s18_s29 }
   0x2   :  { %16 = dma.vmem_to_smem %s14_s26, 16, %s330_s30, [#allocation4] }
   0x3   :  { %21 = dma.vmem_to_smem %s19_s29, 16, %s331_s8, [#allocation4] }
   0x4   :  { %322 = dma.done.wait [#allocation4], 32 }
   0x5   :  { %323 = vsyncadd [#allocation4], 4294967264 }
   0x6   :  { %25 = sfence }
   0x7   :  { %26 = vsyncpa [#allocation9], 0 }
   0x8   :  { %27 = vsyncpa [#allocation12], 0 }
   0x9   :  { %28 = vsyncpa [#allocation10], 0  ;;  %s33_s0 = sshll.u32 %s418_s2, 4  ;;  %s332_s11 = smov [#allocation8]   ;;  %s34_s0 = int_to_ptr.hbm [resolvable:$true] %s33_s0 }
   0xa   :  { %s35_s12 = sshll.u32 %s332_s11, 4  ;;  %s46_s14 = sshll.u32 %s419_s3, 4  ;;  %s36_s12 = int_to_ptr.vmem [resolvable:$true] %s35_s12  ;;  %s47_s14 = int_to_ptr.hbm [resolvable:$true] %s46_s14 }
   0xb   :  { %s333_s15 = smov 128   ;;  %s334_s16 = smov 8  }
   0xc   :  { %41 = dma.hbm_to_vmem [thread:$0]  %s34_s0, 256, %s36_s12, [#allocation9], %s333_s15, %s333_s15, %s334_s16  }
   0xd   :  { %s335_s17 = smov [#allocation11]  }
   0xe   :  { %s48_s18 = sshll.u32 %s335_s17, 4  ;;  %s49_s18 = int_to_ptr.vmem [resolvable:$true] %s48_s18 }
   0xf   :  { %54 = dma.hbm_to_vmem [thread:$0]  %s47_s14, 512, %s49_s18, [#allocation12], %s333_s15, %s333_s15, %s334_s16  }
  0x10   :  { %324 = dma.done.wait [#allocation9], 256  }
  0x11   :  { %325 = vsyncadd [#allocation9], 4294967040 }
  0x12   :  { %326 = dma.done.wait [#allocation12], 512  }
  0x13   :  { %327 = vsyncadd [#allocation12], 4294966784  ;;  %s70_s2 = sld [smem:[#allocation5]]  ;;  %vm73_vm0 = vcmask 253952   ;;  %v224_v16 = vld [vmem:[%s420_s4] ss:$0 sm:$0xff]  ;;  %v163_v24 = vlaneseq  ;;  %v160_v25 = vstv %s422_s6 }
  0x14   :  { %s75_s19 = sld [smem:[#allocation6]]  ;;  %v225_v17 = vld [vmem:[%s421_s5] ss:$0 sm:$0xff]  ;;  %vm155_vm1 = vcmask 261120   ;;  %s336_s4 = smov [#allocation13]   ;;  %vm167_vm2 = vcmask 57344  }
  0x15   :  { %s203_s20 = sld [smem:[#allocation5 + $0x1]]  ;;  %v164_v26 = vand.u32 127, %v163_v24  ;;  %s176_s5 = sshll.u32 %s423_s7, 4  ;;  %s177_s5 = int_to_ptr.hbm [resolvable:$true] %s176_s5 }
  0x16   :  { %s204_s21 = sld [smem:[#allocation6 + $0x1]] }
  0x17   :  { %s205_s22 = sld [smem:[#allocation5 + $0x2]] }
  0x18   :  { %s206_s23 = sld [smem:[#allocation6 + $0x2]] }
  0x19   :  { %s207_s3 = sld [smem:[#allocation5 + $0x3]]  ;;  %s71_s24 = scalar_lea.vmem [#allocation8], %s70_s2 }
  0x1a   :  { %v72_v0 = vld [vmem:[%s71_s24] sm:$0x1]  ;;  %s208_s25 = sld [smem:[#allocation6 + $0x3]]  ;;  %s76_s26 = scalar_lea.vmem [#allocation11], %s75_s19 }
  0x1b   :  { %74 = vst.msk [vmem:[#allocation2] sm:$0x1] %vm73_vm0, %v72_v0  ;;  %v77_v1 = vld [vmem:[%s76_s26] sm:$0x1]  ;;  %s81_s27 = scalar_lea.vmem [#allocation8], %s203_s20  ;;  %s209_s10 = sld [smem:[#allocation5 + $0x4]] }
  0x1c   :  { %78 = vst.msk [vmem:[#allocation3] sm:$0x1] %vm73_vm0, %v77_v1  ;;  %v82_v2 = vld [vmem:[%s81_s27] sm:$0x1]  ;;  %s85_s28 = scalar_lea.vmem [#allocation11], %s204_s21  ;;  %s210_s0 = sld [smem:[#allocation6 + $0x4]] }
  0x1d   :  { %83 = vst.msk [vmem:[#allocation2 + $0x1] sm:$0x1] %vm73_vm0, %v82_v2  ;;  %v86_v3 = vld [vmem:[%s85_s28] sm:$0x1]  ;;  %s90_s29 = scalar_lea.vmem [#allocation8], %s205_s22  ;;  %s211_s11 = sld [smem:[#allocation5 + $0x5]] }
  0x1e   :  { %87 = vst.msk [vmem:[#allocation3 + $0x1] sm:$0x1] %vm73_vm0, %v86_v3  ;;  %v91_v4 = vld [vmem:[%s90_s29] sm:$0x1]  ;;  %s94_s30 = scalar_lea.vmem [#allocation11], %s206_s23  ;;  %s212_s12 = sld [smem:[#allocation6 + $0x5]] }
  0x1f   :  { %92 = vst.msk [vmem:[#allocation2 + $0x2] sm:$0x1] %vm73_vm0, %v91_v4  ;;  %v95_v5 = vld [vmem:[%s94_s30] sm:$0x1]  ;;  %s99_s8 = scalar_lea.vmem [#allocation8], %s207_s3  ;;  %s213_s1 = sld [smem:[#allocation5 + $0x6]] }
  0x20   :  { %96 = vst.msk [vmem:[#allocation3 + $0x2] sm:$0x1] %vm73_vm0, %v95_v5  ;;  %v100_v6 = vld [vmem:[%s99_s8] sm:$0x1]  ;;  %s103_s9 = scalar_lea.vmem [#allocation11], %s208_s25  ;;  %s214_s13 = sld [smem:[#allocation6 + $0x6]] }
  0x21   :  { %101 = vst.msk [vmem:[#allocation2 + $0x3] sm:$0x1] %vm73_vm0, %v100_v6  ;;  %v104_v7 = vld [vmem:[%s103_s9] sm:$0x1]  ;;  %s215_s14 = sld [smem:[#allocation5 + $0x7]]  ;;  %s108_s15 = scalar_lea.vmem [#allocation8], %s209_s10 }
  0x22   :  { %105 = vst.msk [vmem:[#allocation3 + $0x3] sm:$0x1] %vm73_vm0, %v104_v7  ;;  %v109_v8 = vld [vmem:[%s108_s15] sm:$0x1]  ;;  %s216_s16 = sld [smem:[#allocation6 + $0x7]]  ;;  %s112_s17 = scalar_lea.vmem [#allocation11], %s210_s0 }
  0x23   :  { %110 = vst.msk [vmem:[#allocation2 + $0x4] sm:$0x1] %vm73_vm0, %v109_v8  ;;  %v113_v9 = vld [vmem:[%s112_s17] sm:$0x1]  ;;  %s117_s18 = scalar_lea.vmem [#allocation8], %s211_s11  ;;  %s174_s28 = sshll.u32 %s336_s4, 4  ;;  %s175_s28 = int_to_ptr.vmem [resolvable:$true] %s174_s28 }
  0x24   :  { %114 = vst.msk [vmem:[#allocation3 + $0x4] sm:$0x1] %vm73_vm0, %v113_v9  ;;  %v118_v10 = vld [vmem:[%s117_s18] sm:$0x1]  ;;  %s121_s2 = scalar_lea.vmem [#allocation11], %s212_s12 }
  0x25   :  { %119 = vst.msk [vmem:[#allocation2 + $0x5] sm:$0x1] %vm73_vm0, %v118_v10  ;;  %v122_v11 = vld [vmem:[%s121_s2] sm:$0x1]  ;;  %s126_s19 = scalar_lea.vmem [#allocation8], %s213_s1 }
  0x26   :  { %123 = vst.msk [vmem:[#allocation3 + $0x5] sm:$0x1] %vm73_vm0, %v122_v11  ;;  %v127_v12 = vld [vmem:[%s126_s19] sm:$0x1]  ;;  %s130_s20 = scalar_lea.vmem [#allocation11], %s214_s13 }
  0x27   :  { %128 = vst.msk [vmem:[#allocation2 + $0x6] sm:$0x1] %vm73_vm0, %v127_v12  ;;  %v131_v13 = vld [vmem:[%s130_s20] sm:$0x1]  ;;  %s135_s21 = scalar_lea.vmem [#allocation8], %s215_s14 }
  0x28   :  { %132 = vst.msk [vmem:[#allocation3 + $0x6] sm:$0x1] %vm73_vm0, %v131_v13  ;;  %v136_v14 = vld [vmem:[%s135_s21] sm:$0x1]  ;;  %s139_s22 = scalar_lea.vmem [#allocation11], %s216_s16 }
  0x29   :  { %137 = vst.msk [vmem:[#allocation2 + $0x7] sm:$0x1] %vm73_vm0, %v136_v14  ;;  %v140_v15 = vld [vmem:[%s139_s22] sm:$0x1] }
  0x2a   :  { %141 = vst.msk [vmem:[#allocation3 + $0x7] sm:$0x1] %vm73_vm0, %v140_v15 }
  0x30   :  { %v142_v18 = vld [vmem:[#allocation2] sm:$0xff] }
  0x31   :  { %v147_v19 = vmul.f32 %v224_v16, %v142_v18  ;;  %v148_v20 = vld [vmem:[#allocation3] sm:$0xff] }
  0x32   :  { %v153_v21 = vmul.f32 %v225_v17, %v148_v20 }
  0x34   :  { %v154_v22 = vadd.f32 %v153_v21, %v147_v19 }
  0x36   :  { %v156_v23 = vsel %vm155_vm1, %v154_v22, 0.0 }
  0x37   :  { %157 = vadd.xlane.f32.xlu0 %v156_v23 }
  0xaa   :  { %v158_v27 = vpop.xlane.xlu0 %157 }
  0xab   :  { %v161_v28 = vadd.f32 %v160_v25, %v158_v27 }
  0xad   :  { %v165_v29 = vperm.slane %v161_v28, %v164_v26 }
  0xaf   :  { %168 = vst.msk [vmem:[#allocation13] sm:$0x1] %vm167_vm2, %v165_v29 }
  0xb0   :  { %179 = dma.vmem_to_hbm [thread:$0]  %s175_s28, 16, %s177_s5, [#allocation10]  }
  0xb1   :  { %328 = dma.done.wait [#allocation10], 16  }
  0xb2   :  { %329 = vsyncadd [#allocation10], 4294967280 }
  0xb3   :  { %184 = vsyncpa [#allocation9], 1 }
  0xb4   :  { %185 = vsyncpa [#allocation12], 1 }
  0xb5   :  { %186 = vsyncpa [#allocation10], 1 }

</bundles_post_ra>
